<compile_context>
chip_gen: v5e
topology: v5e:2x2
jax: 0.10.0
libtpu: 0.0.40
codegen_flags: <defaults>
</compile_context>

<pallas_src>
import functools

import jax
import jax.numpy as jnp
from jax.experimental import pallas as pl
from jax.experimental.pallas import tpu as pltpu

ALPHA = 2.0
GAMMA = 2.0
LANES = 128
MAX_BLOCK_ROWS = 2048      # (2048, 128) f32 = 1 MiB per input block
NUM_SLICES = 2             # partial sums -> 2-TC split on v7x, harmless elsewhere


def _focal_loss_kernel(x_ref, t_ref, out_ref, acc_ref, *,
                       alpha, gamma, total_n, blk_rows, blocks_per_slice):
    c = pl.program_id(0)
    i = pl.program_id(1)

    @pl.when(i == 0)
    def _():
        acc_ref[...] = jnp.zeros_like(acc_ref)

    x = x_ref[...].astype(jnp.float32)
    t = t_ref[...].astype(jnp.float32)

    # Numerically stable BCE-with-logits (matches torch BCEWithLogits):
    #   bce = max(x, 0) - x*t + log1p(exp(-|x|))
    bce = jnp.maximum(x, 0.0) - x * t + jnp.log1p(jnp.exp(-jnp.abs(x)))
    one_m_pt = 1.0 - jnp.exp(-bce)
    if gamma == 2.0:
        mod = one_m_pt * one_m_pt          # avoid pow -> exp(g*log(.)) on EUP
    else:
        mod = one_m_pt ** gamma
    f_loss = alpha * mod * bce

    # Mask out padded / out-of-range / duplicated-tail-block elements using the
    # *unclamped* global block index b (index_map clamps the DMA, we zero here).
    b = c * blocks_per_slice + i
    row_ids = jax.lax.broadcasted_iota(jnp.int32, (blk_rows, LANES), 0)
    lane_ids = jax.lax.broadcasted_iota(jnp.int32, (blk_rows, LANES), 1)
    elem = (b * blk_rows + row_ids) * LANES + lane_ids
    f_loss = jnp.where(elem < total_n, f_loss, 0.0)

    # Pure-VPU elementwise accumulation (no per-step XLU reduce).
    acc_ref[...] += f_loss

    @pl.when(i == pl.num_programs(1) - 1)
    def _():
        total = jnp.sum(acc_ref[...])            # single XLU reduce per slice
        out_ref[...] = jnp.zeros_like(out_ref) + total


def focal_loss(inputs, targets, alpha=ALPHA, gamma=GAMMA):
    """inputs, targets: identically-shaped arrays. Returns scalar mean focal loss."""
    assert inputs.shape == targets.shape
    total_n = int(inputs.size)

    flat_x = inputs.reshape(-1)
    flat_t = targets.reshape(-1)
    # At most a tiny (<128-element) pad so the flat array reshapes to a
    # lane-dense (rows, 128) slab; padded elements are masked in-kernel.
    pad = (-total_n) % LANES
    if pad:
        flat_x = jnp.pad(flat_x, (0, pad))
        flat_t = jnp.pad(flat_t, (0, pad))
    rows = (total_n + pad) // LANES
    x2 = flat_x.reshape(rows, LANES)
    t2 = flat_t.reshape(rows, LANES)

    blk_rows = min(MAX_BLOCK_ROWS, ((rows + 7) // 8) * 8)
    n_blocks = pl.cdiv(rows, blk_rows)
    blocks_per_slice = pl.cdiv(n_blocks, NUM_SLICES)

    def in_map(c, i):
        # Clamp so a duplicated tail block never DMAs out of bounds; its
        # contribution is zeroed by the in-kernel mask.
        return (jnp.minimum(c * blocks_per_slice + i, n_blocks - 1), 0)

    kernel = functools.partial(
        _focal_loss_kernel,
        alpha=float(alpha), gamma=float(gamma), total_n=total_n,
        blk_rows=blk_rows, blocks_per_slice=blocks_per_slice)

    partials = pl.pallas_call(
        kernel,
        out_shape=jax.ShapeDtypeStruct((NUM_SLICES, 8, LANES), jnp.float32),
        grid_spec=pltpu.PrefetchScalarGridSpec(
            num_scalar_prefetch=0,
            grid=(NUM_SLICES, blocks_per_slice),
            in_specs=[
                pl.BlockSpec((blk_rows, LANES), in_map),
                pl.BlockSpec((blk_rows, LANES), in_map),
            ],
            out_specs=pl.BlockSpec((1, 8, LANES), lambda c, i: (c, 0, 0)),
            scratch_shapes=[pltpu.VMEM((blk_rows, LANES), jnp.float32)],
        ),
        compiler_params=pltpu.CompilerParams(
            dimension_semantics=("parallel", "arbitrary")),
    )(x2, t2)

    return partials[:, 0, 0].sum() / total_n


def focal_loss_ref(inputs, targets, alpha=ALPHA, gamma=GAMMA):
    x = inputs.astype(jnp.float32)
    t = targets.astype(jnp.float32)
    bce = jnp.maximum(x, 0.0) - x * t + jnp.log1p(jnp.exp(-jnp.abs(x)))
    pt = jnp.exp(-bce)
    return jnp.mean(alpha * (1.0 - pt) ** gamma * bce)


if __name__ == "__main__":
    key = jax.random.PRNGKey(0)
    kx, kt = jax.random.split(key)

    # Small NCHW-shaped logits and binary targets, as the training loop implies.
    B, C, H, W = 2, 4, 16, 16
    inputs = jax.random.normal(kx, (B, C, H, W), dtype=jnp.float32) * 2.0
    targets = jax.random.bernoulli(kt, 0.3, (B, C, H, W)).astype(jnp.float32)

    loss = focal_loss(inputs, targets)
    loss = jax.block_until_ready(loss)

    ref = focal_loss_ref(inputs, targets)
    assert jnp.allclose(loss, ref, rtol=1e-5, atol=1e-6), (loss, ref)
    print("KERNEL_OK")
</pallas_src>

<mosaic_0001>
module attributes {stable_mosaic.version = 11 : i64} {
  func.func @_focal_loss_kernel(%arg0: i32, %arg1: i32, %arg2: memref<16x128xf32, #tpu.memory_space<vmem>>, %arg3: memref<16x128xf32, #tpu.memory_space<vmem>>, %arg4: memref<1x8x128xf32, #tpu.memory_space<vmem>>, %arg5: memref<16x128xf32, #tpu.memory_space<vmem>>) attributes {dimension_semantics = [#tpu.dimension_semantics<parallel>, #tpu.dimension_semantics<arbitrary>], iteration_bounds = array<i64: 2, 1>, scalar_prefetch = 0 : i64, scratch_operands = 1 : i64, tpu.core_type = #tpu.core_type<tc>, window_params = [{transform_indices = @transform_0, window_bounds = array<i64: 16, 128>}, {transform_indices = @transform_1, window_bounds = array<i64: 16, 128>}, {transform_indices = @transform_2, window_bounds = array<i64: 1, 8, 128>}]} {
    %c0_i32 = arith.constant 0 : i32
    %0 = arith.cmpi eq, %arg1, %c0_i32 : i32
    %1 = arith.extui %0 : i1 to i32
    %c0_i32_0 = arith.constant 0 : i32
    %2 = arith.cmpi ne, %1, %c0_i32_0 : i32
    scf.if %2 {
      %cst_15 = arith.constant 0.000000e+00 : f32
      %44 = vector.broadcast %cst_15 : f32 to vector<16x128xf32>
      %c0_16 = arith.constant 0 : index
      %c0_17 = arith.constant 0 : index
      %45 = vector.load %arg5[%c0_16, %c0_17] : memref<16x128xf32, #tpu.memory_space<vmem>>, vector<16x128xf32>
      tpu.vector_store %arg5[%c0_16, %c0_17], %44 {strides = array<i32>} : memref<16x128xf32, #tpu.memory_space<vmem>>, vector<16x128xf32>,
    } else {
    }
    %c0 = arith.constant 0 : index
    %c0_1 = arith.constant 0 : index
    %3 = vector.load %arg2[%c0, %c0_1] : memref<16x128xf32, #tpu.memory_space<vmem>>, vector<16x128xf32>
    %c0_2 = arith.constant 0 : index
    %c0_3 = arith.constant 0 : index
    %4 = vector.load %arg3[%c0_2, %c0_3] : memref<16x128xf32, #tpu.memory_space<vmem>>, vector<16x128xf32>
    %cst = arith.constant 0.000000e+00 : f32
    %5 = vector.broadcast %cst : f32 to vector<16x128xf32>
    %6 = arith.maximumf %3, %5 : vector<16x128xf32>
    %7 = arith.mulf %3, %4 : vector<16x128xf32>
    %8 = arith.subf %6, %7 : vector<16x128xf32>
    %9 = math.absf %3 : vector<16x128xf32>
    %cst_4 = arith.constant 0.000000e+00 : f32
    %10 = vector.broadcast %cst_4 : f32 to vector<16x128xf32>
    %11 = arith.subf %10, %9 : vector<16x128xf32>
    %12 = math.exp %11 : vector<16x128xf32>
    %13 = math.log1p %12 : vector<16x128xf32>
    %14 = arith.addf %8, %13 : vector<16x128xf32>
    %cst_5 = arith.constant 0.000000e+00 : f32
    %15 = vector.broadcast %cst_5 : f32 to vector<16x128xf32>
    %16 = arith.subf %15, %14 : vector<16x128xf32>
    %17 = math.exp %16 : vector<16x128xf32>
    %cst_6 = arith.constant 1.000000e+00 : f32
    %18 = vector.broadcast %cst_6 : f32 to vector<16x128xf32>
    %19 = arith.subf %18, %17 : vector<16x128xf32>
    %20 = arith.mulf %19, %19 : vector<16x128xf32>
    %cst_7 = arith.constant 2.000000e+00 : f32
    %21 = vector.broadcast %cst_7 : f32 to vector<16x128xf32>
    %22 = arith.mulf %21, %20 : vector<16x128xf32>
    %23 = arith.mulf %22, %14 : vector<16x128xf32>
    %c1_i32 = arith.constant 1 : i32
    %24 = arith.muli %arg0, %c1_i32 : i32
    %25 = arith.addi %24, %arg1 : i32
    %26 = tpu.iota {dimensions = array<i32: 0>} : vector<16x128xi32>
    %27 = tpu.iota {dimensions = array<i32: 1>} : vector<16x128xi32>
    %c16_i32 = arith.constant 16 : i32
    %28 = arith.muli %25, %c16_i32 : i32
    %29 = vector.broadcast %28 : i32 to vector<16x128xi32>
    %30 = arith.addi %29, %26 : vector<16x128xi32>
    %c128_i32 = arith.constant 128 : i32
    %31 = vector.broadcast %c128_i32 : i32 to vector<16x128xi32>
    %32 = arith.muli %30, %31 : vector<16x128xi32>
    %33 = arith.addi %32, %27 : vector<16x128xi32>
    %c2048_i32 = arith.constant 2048 : i32
    %34 = vector.broadcast %c2048_i32 : i32 to vector<16x128xi32>
    %35 = arith.cmpi slt, %33, %34 : vector<16x128xi32>
    %cst_8 = arith.constant 0.000000e+00 : f32
    %36 = vector.broadcast %cst_8 : f32 to vector<16x128xf32>
    %37 = arith.select %35, %23, %36 : vector<16x128xi1>, vector<16x128xf32>
    %c0_9 = arith.constant 0 : index
    %c0_10 = arith.constant 0 : index
    %38 = vector.load %arg5[%c0_9, %c0_10] : memref<16x128xf32, #tpu.memory_space<vmem>>, vector<16x128xf32>
    %39 = arith.addf %38, %37 : vector<16x128xf32>
    %c0_11 = arith.constant 0 : index
    %c0_12 = arith.constant 0 : index
    %40 = vector.load %arg5[%c0_11, %c0_12] : memref<16x128xf32, #tpu.memory_space<vmem>>, vector<16x128xf32>
    tpu.vector_store %arg5[%c0_11, %c0_12], %39 {strides = array<i32>} : memref<16x128xf32, #tpu.memory_space<vmem>>, vector<16x128xf32>,
    %c0_i32_13 = arith.constant 0 : i32
    %41 = arith.cmpi eq, %arg1, %c0_i32_13 : i32
    %42 = arith.extui %41 : i1 to i32
    %c0_i32_14 = arith.constant 0 : i32
    %43 = arith.cmpi ne, %42, %c0_i32_14 : i32
    scf.if %43 {
      %c0_15 = arith.constant 0 : index
      %c0_16 = arith.constant 0 : index
      %44 = vector.load %arg5[%c0_15, %c0_16] : memref<16x128xf32, #tpu.memory_space<vmem>>, vector<16x128xf32>
      %45 = vector.shape_cast %44 : vector<16x128xf32> to vector<1x16x128xf32>
      %cst_17 = arith.constant dense<0.000000e+00> : vector<1xf32>
      %46 = vector.multi_reduction <add>, %45, %cst_17 [1, 2] : vector<1x16x128xf32> to vector<1xf32>
      %47 = vector.shape_cast %46 : vector<1xf32> to vector<1x1x1xf32>
      %48 = vector.extract %47[0, 0, 0] : f32 from vector<1x1x1xf32>
      %cst_18 = arith.constant 0.000000e+00 : f32
      %49 = vector.broadcast %cst_18 : f32 to vector<1x8x128xf32>
      %50 = vector.broadcast %48 : f32 to vector<1x8x128xf32>
      %51 = arith.addf %49, %50 : vector<1x8x128xf32>
      %c0_19 = arith.constant 0 : index
      %c0_20 = arith.constant 0 : index
      %c0_21 = arith.constant 0 : index
      %52 = vector.load %arg4[%c0_19, %c0_20, %c0_21] : memref<1x8x128xf32, #tpu.memory_space<vmem>>, vector<1x8x128xf32>
      tpu.vector_store %arg4[%c0_19, %c0_20, %c0_21], %51 {strides = array<i32>} : memref<1x8x128xf32, #tpu.memory_space<vmem>>, vector<1x8x128xf32>,
    } else {
    }
    return
  }
  func.func @transform_0(%arg0: i32, %arg1: i32) -> (i32, i32) {
    %c1_i32 = arith.constant 1 : i32
    %0 = arith.muli %arg0, %c1_i32 : i32
    %1 = arith.addi %0, %arg1 : i32
    %c0_i32 = arith.constant 0 : i32
    %2 = arith.minsi %1, %c0_i32 : i32
    %c0_i32_0 = arith.constant 0 : i32
    %c0_i32_1 = arith.constant 0 : i32
    return %2, %c0_i32_0 : i32, i32
  }
  func.func @transform_1(%arg0: i32, %arg1: i32) -> (i32, i32) {
    %c1_i32 = arith.constant 1 : i32
    %0 = arith.muli %arg0, %c1_i32 : i32
    %1 = arith.addi %0, %arg1 : i32
    %c0_i32 = arith.constant 0 : i32
    %2 = arith.minsi %1, %c0_i32 : i32
    %c0_i32_0 = arith.constant 0 : i32
    %c0_i32_1 = arith.constant 0 : i32
    return %2, %c0_i32_0 : i32, i32
  }
  func.func @transform_2(%arg0: i32, %arg1: i32) -> (i32, i32, i32) {
    %c0_i32 = arith.constant 0 : i32
    %c0_i32_0 = arith.constant 0 : i32
    %c0_i32_1 = arith.constant 0 : i32
    return %arg0, %c0_i32, %c0_i32_0 : i32, i32, i32
  }
}

</mosaic_0001>

<bundles_post_ra>
// kernel: tpu_custom_call.1
= control target key start
LH: loop header
LB: loop body
LE: loop exit
PB: predicated region body
PF: predicated region fallthrough
CT: control target
= control target key end

     0   :  { %7 = vsyncpa [#allocation4], 0  ;;  %s946_s0 = inlined_call_operand.hbm [shape: f32[16,128], index: 0, kind: input, shape index: {}]   ;;  %s947_s1 = inlined_call_operand.hbm [shape: f32[16,128], index: 1, kind: input, shape index: {}]   ;;  %s948_s2 = inlined_call_operand.hbm [shape: f32[2,8,128], index: 2, kind: output, shape index: {}]  }
   0x1   :  { %9 = vsyncpa [#allocation4 + $0x1], 0 }
   0x2   :  { %10 = vsyncpa [#allocation7], 0 }
   0x3   :  { %12 = vsyncpa [#allocation7 + $0x1], 0 }
   0x4   :  { %13 = vsyncpa [#allocation5], 0 }
   0x5   :  { %15 = vsyncpa [#allocation5 + $0x1], 0  ;;  %s777_s9 = smov 0   ;;  %s779_s10 = smov 0  }
   0x6   :  { %s781_s11 = smov 0   ;;  %s783_s12 = smov 0  }
   0x7   :  { %s785_s13 = smov 0   ;;  %s787_s14 = smov 0  }
   0x8   :  { %s789_s15 = smov 0   ;;  %s791_s16 = smov 0  }
   0x9 LB: > { %s461_s17 = sadd.s32 4294967295, %s756_s16   ;;  %s462_s18 = sadd.s32 4294967294, %s756_s16   ;;  %s756_s16 = sphi %s791_s16, %s21_s16   ;;  %s752_s15 = sphi %s789_s15, %s960_s15   ;;  %s748_s14 = sphi %s787_s14, %s959_s14   ;;  %s744_s13 = sphi %s785_s13, %s936_s13   ;;  %s740_s12 = sphi %s783_s12, %s958_s12   ;;  %s736_s11 = sphi %s781_s11, %s957_s11   ;;  %s732_s10 = sphi %s779_s10, %s956_s10   ;;  %s728_s9 = sphi %s777_s9, %s955_s9  }
   0xa   : > { %s33_s19 = sadd.s32 1, %s752_s15  ;;  %p725_p1 = scmp.ne.s32.totalorder %s744_s13, 0 }
   0xb   : > { %p35_p0 = scmp.ge.s32.totalorder %s33_s19, 2  ;;  %p54_p2 = scmp.eq.s32.totalorder %s756_s16, 0 }
   0xc   : > { %p59_p3 = scmp.ne.s32.totalorder %s744_s13, %s740_s12  ;;  %p60_p5 = scmp.eq.s32.totalorder %s461_s17, 0 }
   0xd   : > { %s962_s19 = smov (%p35_p0, %s33_s19), 0  ;;  %p823_p4 = por %p725_p1, %p54_p2 }
   0xe   : > { %p827_p6 = por %p60_p5, %p59_p3  ;;  %s101_s22 = ssub.s32 %s752_s15, %s962_s19 }
   0xf   : > { %p102_p7 = scmp.eq.s32.totalorder %s101_s22, 0  ;;  %s104_s23 = sadd.s32 1, %s736_s11 }
  0x10   : > { %p114_p8 = scmp.ne.s32.totalorder %s736_s11, %s732_s10  ;;  %p115_p9 = scmp.eq.s32.totalorder %s461_s17, 1 }
  0x11   : > { %s835_s24 = scalar_select %p102_p7, %s736_s11, %s104_s23  }
  0x12   : > { %p120_p10 = scmp.ne.s32.totalorder %s732_s10, %s728_s9  ;;  %p121_p11 = scmp.eq.s32.totalorder %s462_s18, 1 }
  0x13   : > { %p841_p12 = por %p115_p9, %p114_p8  ;;  %p464_p13 = scmp.ge.s32.totalorder %s756_s16, 2 }
  0x14   : > { %p846_p0 = por %p121_p11, %p120_p10  ;;  %p501_p1 = scmp.lt.s32.totalorder %s756_s16, 2 }
  0x15   : > { %s154_s29 = sshll.u32 %s946_s0, 4  ;;  %s758_s30 = smov [#allocation3]   ;;  %s155_s29 = int_to_ptr.hbm [resolvable:$true] %s154_s29 }
  0x16   : > { %s156_s3 = sshll.u32 %s758_s30, 4  ;;  %p856_p2 = pnand %p501_p1, %p823_p4  ;;  %s157_s3 = int_to_ptr.vmem [resolvable:$true] %s156_s3 }
  0x17   : > { %p471_p3 = scmp.ge.s32.totalorder %s756_s16, 1  ;;  %p189_p5 = scmp.lt.s32.totalorder %s756_s16, 3 }
  0x18   : > { %s589_s5 = sshra.s32 %s155_s29, 4  ;;  %p593_p8 = pneg %p856_p2  ;;  %s590_s5 = int_to_ptr.hbm [resolvable:$true] %s589_s5 }
  0x19   : > { %s591_s6 = scalar_lea.hbm %s590_s5, 16  ;;  %s596_s12 = scalar_lea.hbm %s946_s0, 16 }
  0x1a   : > { %p592_p7 = scmp.ne.s32.totalorder %s590_s5, %s591_s6  ;;  %p598_p4 = scmp.lt.s32.totalorder %s596_s12, %s591_s6 }
  0x1c   : > { %p594_p9 = pnand %p593_p8, %p592_p7 }
  0x1e   : > { %p595_p10 = pneg %p594_p9 }
  0x20   : > { %p600_p11 = pnand %p598_p4, %p595_p10 }
  0x22   : > { %603 = shalt.err (!%p600_p11)
}
  0x23   : > { %s759_s17 = smov 128   ;;  %s760_s18 = smov 8  }
  0x24   : > { %493 = dma.hbm_to_vmem [thread:$0]  (!%p856_p2), %s155_s29, 256, %s157_s3, [#allocation4], %s759_s17, %s759_s17, %s760_s18  }
  0x25   : > { %p876_p1 = pnand %p471_p3, %p189_p5  ;;  %s179_s27 = sshll.u32 %s947_s1, 4  ;;  %s180_s27 = int_to_ptr.hbm [resolvable:$true] %s179_s27 }
  0x26   : > { %s761_s28 = smov [#allocation6]   ;;  %s619_s5 = sshra.s32 %s180_s27, 4  ;;  %s620_s5 = int_to_ptr.hbm [resolvable:$true] %s619_s5 }
  0x27   : > { %s181_s30 = sshll.u32 %s761_s28, 4  ;;  %s621_s6 = scalar_lea.hbm %s620_s5, 16  ;;  %s182_s30 = int_to_ptr.vmem [resolvable:$true] %s181_s30 }
  0x28   : > { %p622_p7 = scmp.ne.s32.totalorder %s620_s5, %s621_s6  ;;  %s626_s7 = scalar_lea.hbm %s947_s1, 16 }
  0x29   : > { %p628_p3 = scmp.lt.s32.totalorder %s626_s7, %s621_s6 }
  0x2a   : > { %p624_p9 = pnand %p622_p7, %p593_p8 }
  0x2c   : > { %p625_p10 = pneg %p624_p9 }
  0x2e   : > { %p630_p5 = pnand %p628_p3, %p625_p10 }
  0x30   : > { %633 = shalt.err (!%p630_p5)
}
  0x31   : > { %496 = dma.hbm_to_vmem [thread:$0]  (!%p856_p2), %s180_s27, 256, %s182_s30, [#allocation7], %s759_s17, %s759_s17, %s760_s18  }
  0x32   : > { %193 = sbr.rel (%p876_p1) target bundleno = 291 (0x123), region = 28  ;;  %s195_s8 = sand.u32 (!%p876_p1), 1, %s744_s13  }
  0x33   : > { %s472_s12 = sshll.u32 (!%p876_p1), %s195_s8, 4  ;;  %s196_s22 = scalar_lea.sflag (!%p876_p1), [#allocation4], %s195_s8 }
  0x34   : > { %s199_s23 = scalar_lea.vmem (!%p876_p1), [#allocation3], %s472_s12 }
  0x37   : > { %714 = dma.done.wait (%p827_p6), %s196_s22, 256  }
  0x38   : > { %716 = vsyncadd (%p827_p6), %s196_s22, 4294967040  ;;  %s206_s28 = scalar_lea.sflag [#allocation7], %s195_s8  ;;  %s209_s5 = scalar_lea.vmem [#allocation6], %s472_s12 }
  0x39   : > { %718 = dma.done.wait (%p827_p6), %s206_s28, 256  }
  0x3a   : > { %720 = vsyncadd (%p827_p6), %s206_s28, 4294967040  ;;  %v250_v0 = vld [vmem:[%s199_s23] sm:$0xff]  ;;  %v251_v1 = vld [vmem:[%s199_s23 + $0x8] sm:$0xff]  ;;  %v303_v25 = vlaneseq  ;;  %s475_s21 = sshll.u32 %s748_s14, 4  ;;  %s233_s4 = sand.u32 1, %s732_s10  }
  0x3b   : > { %v260_v2 = vand.u32 2147483647, %v250_v0  ;;  %v261_v3 = vand.u32 2147483647, %v251_v1  ;;  %v252_v12 = vld [vmem:[%s209_s5] sm:$0xff]  ;;  %v253_v15 = vld [vmem:[%s209_s5 + $0x8] sm:$0xff]  ;;  %v309_v41 = vstv %s475_s21 }
  0x3c   : > { %v254_v17 = vmax.f32 %v250_v0, 0.0  ;;  %v256_v18 = vmul.f32 %v252_v12, %v250_v0  ;;  %v255_v21 = vmax.f32 %v251_v1, 0.0  ;;  %v257_v22 = vmul.f32 %v253_v15, %v251_v1  ;;  %s474_s17 = sshll.u32 %s233_s4, 3  ;;  %s477_s18 = sshll.u32 %s748_s14, 3 }
  0x3d   : > { %v262_v4 = vsub.f32 0.0, %v260_v2  ;;  %v263_v5 = vsub.f32 0.0, %v261_v3  ;;  %v304_v34 = vshrl.u32 %v303_v25, 7  ;;  %v307_v46 = vand.u32 127, %v303_v25  ;;  %s355_s30 = scalar_lea.hbm %s948_s2, %s477_s18  ;;  %s235_s6 = scalar_lea.vmem [#allocation8], %s474_s17 }
  0x3e   : > { %v258_v27 = vsub.f32 %v254_v17, %v256_v18  ;;  %v259_v30 = vsub.f32 %v255_v21, %v257_v22  ;;  %s357_s29 = sshll.u32 %s235_s6, 4  ;;  %s359_s3 = sshll.u32 %s355_s30, 4  ;;  %s358_s29 = int_to_ptr.vmem [resolvable:$true] %s357_s29  ;;  %s360_s3 = int_to_ptr.hbm [resolvable:$true] %s359_s3 }
  0x3f   : > { %v264_v6 = vmul.f32 1.442695, %v262_v4  ;;  %v266_v7 = vmul.f32 1.442695, %v263_v5  ;;  %v305_v40 = vadd.s32 8, %v304_v34  ;;  %v310_v44 = vadd.s32 %v309_v41, %v304_v34  ;;  %s345_s8 = scalar_lea.sflag [#allocation5], %s233_s4 }
  0x40   : > { %s663_s12 = sshra.s32 %s360_s3, 4  ;;  %s669_s28 = scalar_lea.hbm %s948_s2, 16  ;;  %s664_s12 = int_to_ptr.hbm [resolvable:$true] %s663_s12 }
  0x41   : > { %577 = vpow2.f32 %v264_v6  ;;  %v311_v45 = vadd.s32 %v309_v41, %v305_v40  ;;  %v312_v47 = vmul.u32 128, %v310_v44  ;;  %s665_s22 = scalar_lea.hbm %s664_s12, 8  ;;  %p670_p4 = scmp.lt.s32.totalorder %s664_s12, %s948_s2 }
  0x42   : > { %579 = vpow2.f32 %v266_v7  ;;  %p666_p6 = scmp.ne.s32.totalorder %s664_s12, %s665_s22  ;;  %p671_p11 = scmp.lt.s32.totalorder %s669_s28, %s665_s22 }
  0x43   : > { %v313_v48 = vmul.u32 128, %v311_v45  ;;  %v314_v53 = vadd.s32 %v312_v47, %v307_v46 }
  0x44   : > { %p667_p2 = pnand %p666_p6, %p841_p12  ;;  %p672_p1 = por %p671_p11, %p670_p4 }
  0x45   : > { %v315_v55 = vadd.s32 %v313_v48, %v307_v46  ;;  %vm316_vm2 = vcmp.lt.s32.totalorder %v314_v53, 2048 }
  0x46   : > { %p668_p8 = pneg %p667_p2 }
  0x47   : > { %v578_v8 = vpop.eup %577  ;;  %vm317_vm3 = vcmp.lt.s32.totalorder %v315_v55, 2048 }
  0x48   : > { %v580_v9 = vpop.eup %579  ;;  %v268_v10 = vadd.f32 1.0, %v578_v8  ;;  %v271_v11 = vmul.f32 -0.5, %v578_v8  ;;  %v274_v19 = vand.u32 2147483647, %v578_v8  ;;  %p673_p7 = pnand %p672_p1, %p668_p8 }
  0x49   : > { %v277_v13 = vadd.f32 1.0, %v580_v9  ;;  %v280_v14 = vmul.f32 -0.5, %v580_v9  ;;  %v283_v23 = vand.u32 2147483647, %v580_v9 }
  0x4a   : > { %581 = vlog2.f32 %v268_v10  ;;  %v272_v16 = vadd.f32 1.0, %v271_v11  ;;  %vm275_vm0 = vcmp.lt.f32.partialorder %v274_v19, 0.0004427343 }
  0x4b   : > { %583 = vlog2.f32 %v277_v13  ;;  %v281_v20 = vadd.f32 1.0, %v280_v14  ;;  %vm284_vm1 = vcmp.lt.f32.partialorder %v283_v23, 0.0004427343 }
  0x4c   : > { %v273_v24 = vmul.f32 %v578_v8, %v272_v16 }
  0x4d   : > { %v282_v28 = vmul.f32 %v580_v9, %v281_v20 }
  0x50   : > { %v582_v26 = vpop.eup %581 }
  0x51   : > { %v584_v29 = vpop.eup %583  ;;  %v270_v31 = vmul.f32 0.6931472, %v582_v26 }
  0x52   : > { %v279_v32 = vmul.f32 0.6931472, %v584_v29 }
  0x53   : > { %v276_v33 = vsel %vm275_vm0, %v273_v24, %v270_v31 }
  0x54   : > { %v285_v35 = vsel %vm284_vm1, %v282_v28, %v279_v32  ;;  %v286_v36 = vadd.f32 %v276_v33, %v258_v27 }
  0x55   : > { %v287_v37 = vadd.f32 %v285_v35, %v259_v30 }
  0x56   : > { %v288_v38 = vsub.f32 0.0, %v286_v36 }
  0x57   : > { %v289_v39 = vsub.f32 0.0, %v287_v37 }
  0x58   : > { %v290_v42 = vmul.f32 1.442695, %v288_v38 }
  0x59   : > { %v292_v43 = vmul.f32 1.442695, %v289_v39 }
  0x5a   : > { %585 = vpow2.f32 %v290_v42 }
  0x5b   : > { %587 = vpow2.f32 %v292_v43 }
  0x60   : > { %v586_v49 = vpop.eup %585 }
  0x61   : > { %v588_v50 = vpop.eup %587  ;;  %v294_v51 = vsub.f32 1.0, %v586_v49 }
  0x62   : > { %v295_v52 = vsub.f32 1.0, %v588_v50 }
  0x63   : > { %v296_v54 = vmul.f32 %v294_v51, %v294_v51 }
  0x64   : > { %v297_v56 = vmul.f32 %v295_v52, %v295_v52 }
  0x65   : > { %v298_v57 = vmul.f32 2.0, %v296_v54 }
  0x66   : > { %v299_v58 = vmul.f32 2.0, %v297_v56 }
  0x67   : > { %v300_v59 = vmul.f32 %v298_v57, %v286_v36 }
  0x68   : > { %v301_v60 = vmul.f32 %v299_v58, %v287_v37 }
  0x69   : > { %v318_v61 = vsel %vm316_vm2, %v300_v59, 0.0 }
  0x6a   : > { %v319_v62 = vsel %vm317_vm3, %v301_v60, 0.0 }
  0x6b   : > { %v331_v63 = vadd.f32 %v319_v62, %v318_v61 }
  0x6d   : > { %332 = vadd.xlane.f32.xlu0 %v331_v63 }
  0xe0   : > { %v333_v0 = vpop.xlane.xlu0 %332 }
  0xe1   : > { %v334_v1 = vrot.slane %v333_v0, 4 }
  0xe3   : > { %v335_v2 = vadd.f32 %v334_v1, %v333_v0 }
  0xe5   : > { %v336_v3 = vrot.slane %v335_v2, 2 }
  0xe7   : > { %v337_v4 = vadd.f32 %v336_v3, %v335_v2 }
  0xe9   : > { %v338_v5 = vrot.slane %v337_v4, 1 }
  0xeb   : > { %v339_v6 = vadd.f32 %v338_v5, %v337_v4 }
  0xed   : > { %482 = vpush %v339_v6 }
 0x11e   : > { %s483_s7 = spop %482 }
 0x11f   : > { %v341_v7 = vstv %s483_s7 }
 0x120   : > { %343 = vst [vmem:[%s235_s6] sm:$0xff] %v341_v7 }
 0x121   : > { %676 = shalt.err (!%p673_p7)
}
 0x122   : > { %488 = dma.vmem_to_hbm [thread:$0]  (%p841_p12), %s358_s29, 128, %s360_s3, %s345_s8  }
 0x123 PF: > { %s371_s4 = sand.u32 1, %s728_s9   ;;  %p498_p9 = pnand %p464_p13, %p846_p0 }
 0x124   : > { %s372_s17 = scalar_lea.sflag [#allocation5], %s371_s4 }
 0x125   : > { %p499_p10 = pneg %p498_p9 }
 0x127   : > { %722 = dma.done.wait (%p499_p10), %s372_s17, 128  }
 0x128   : > { %724 = vsyncadd (%p499_p10), %s372_s17, 4294967168  ;;  %s21_s16 = sadd.s32 1, %s756_s16   ;;  %s955_s9 = smov %s732_s10 }
 0x129   : > { %p18_p3 = scmp.ge.s32.totalorder %s21_s16, 4   ;;  %s956_s10 = smov %s736_s11 }
 0x12a   : > { %s957_s11 = smov %s835_s24  ;;  %s958_s12 = smov %s744_s13 }
 0x12b   : > { %s936_s13 = smov 0   ;;  %s959_s14 = smov %s752_s15 }
 0x12c   : > { %s960_s15 = smov %s962_s19  ;;  %20 = sbr.rel (!%p18_p3) target bundleno = 9 (0x9), region = 94 }
 0x131   :  { %378 = vsyncpa [#allocation4], 1 }
 0x132   :  { %380 = vsyncpa [#allocation4 + $0x1], 1 }
 0x133   :  { %381 = vsyncpa [#allocation7], 1 }
 0x134   :  { %383 = vsyncpa [#allocation7 + $0x1], 1 }
 0x135   :  { %384 = vsyncpa [#allocation5], 1 }
 0x136   :  { %386 = vsyncpa [#allocation5 + $0x1], 1 }

</bundles_post_ra>
